<compile_context>
chip_gen: v6e
topology: v6e:2x2x1
jax: 0.10.0
libtpu: 0.0.40
codegen_flags: <defaults>
</compile_context>

<pallas_src>
import jax
import jax.numpy as jnp
from jax.experimental import pallas as pl
from jax.experimental.pallas import tpu as pltpu


_LANE = 128
_MAX_LANE_TILE = 2048          # >=512 lanes is already ~85% of the HBM roofline


def _round_up(v, m):
    return ((v + m - 1) // m) * m


def _device_profile():
    """Per-generation DMA/tiling knobs (best-effort query, conservative fallback)."""
    kind = ""
    try:
        kind = jax.devices()[0].device_kind.lower()
    except Exception:
        pass
    vmem_cap = None
    try:
        vmem_cap = int(pltpu.get_tpu_info().vmem_capacity_bytes)
    except Exception:
        pass

    if ("v5 lite" in kind) or ("v5e" in kind) or ("v5lite" in kind):
        # v5e: ~820 GB/s HBM -> 4 MiB blocks already make per-step overhead <4%.
        target, limit, two_tc = 4 << 20, 32 << 20, False
    elif "7" in kind:
        # v7x: ~3.2 TB/s per TC, 64 MiB VMEM per TC, 2 TensorCores per chip.
        target, limit, two_tc = 8 << 20, 48 << 20, True
    elif "v6" in kind:
        # v6e: 128 MiB VMEM -> bigger blocks, fewer grid steps.
        target, limit, two_tc = 8 << 20, 56 << 20, False
    else:
        target, limit, two_tc = 4 << 20, 32 << 20, False

    if vmem_cap is not None:
        # Leave headroom of physical VMEM for runtime / internal scratch.
        limit = min(limit, max(16 << 20, vmem_cap - (12 << 20)))
        target = min(target, max(1 << 20, limit // 6))
    return target, limit, two_tc


def _pick_tile(dim, base, cap):
    """Tile for `dim`: a multiple of `base` (or the full dim), <= cap.
    Prefers an exact divisor; otherwise returns cap and lets a cdiv grid mask the
    ragged edge block (never collapses to tiny tiles for awkward sizes)."""
    if dim <= cap:
        return dim
    cap = max(base, cap - cap % base)
    best = 0
    t = base
    while t <= cap:
        if dim % t == 0:
            best = t
        t += base
    if best >= max(base, cap // 2):
        return best
    return cap


def _pick_group(S, E):
    """Flat path (E % 128 != 0): pick g | S so x is viewed as (B, g, (S//g)*E)
    with a lane-aligned (or cheaply padded) last dim and enough rows per block
    for full sublane utilisation even at batch=1."""
    divisors = [d for d in range(1, S + 1) if S % d == 0]
    aligned = [g for g in divisors if ((S // g) * E) % _LANE == 0]
    good = [g for g in aligned if (S // g) * E >= 512]
    if good:
        return max(good)
    padded = [g for g in divisors if (S // g) * E >= 1024]
    if padded:
        return max(padded)
    if aligned:
        return max(aligned)
    return 1


def _pos_add_kernel(x_ref, p_ref, o_ref):
    # x_ref: (tR0, tR1, tC); p_ref: (tR1, 1) or (tR1, tC).
    # Single VPU broadcast-add; the kernel is mem-bound so this compute is free.
    o_ref[...] = (x_ref[...] + p_ref[...]).astype(o_ref.dtype)


def positional_embedding(x, pos_emb):
    """x: (B, S, E), pos_emb: (S, 1). Returns x + pos_emb (broadcast over B and E)."""
    B, S, E = x.shape
    assert pos_emb.shape == (S, 1)
    dtype = x.dtype
    itemsize = jnp.dtype(dtype).itemsize
    sub = max(8, 32 // itemsize)          # sublane multiple: 8 f32 / 16 bf16 / 32 int8
    target, vmem_limit, two_tc = _device_profile()
    budget = vmem_limit - (4 << 20)       # pipeline headroom inside the scoped limit

    # ---- lane-dense 3-D view (R0, R1, C): pos varies only along R1 --------------
    if E % _LANE == 0:
        # Row path: original layout; pos stays a tiny (S, 1) column (no jnp.tile).
        R0, R1, C = B, S, E
        c_orig = C
        x3 = x
        pos3 = pos_emb.astype(dtype)                              # (R1, 1)
        pos_is_column = True
    else:
        # Flat path: group S so the last dim is (nearly) a multiple of 128 lanes.
        g = _pick_group(S, E)
        c_orig = (S // g) * E
        C = _round_up(c_orig, _LANE)
        R0, R1 = B, g
        x3 = x.reshape(B, g, c_orig)
        pos3 = jnp.broadcast_to(pos_emb, (S, E)).reshape(g, c_orig).astype(dtype)
        if C != c_orig:                   # pad a few lanes -> full-width, unmasked stores
            x3 = jnp.pad(x3, ((0, 0), (0, 0), (0, C - c_orig)))
            pos3 = jnp.pad(pos3, ((0, 0), (0, C - c_orig)))
        pos_is_column = False

    # ---- tile sizes --------------------------------------------------------------
    tC = _pick_tile(C, _LANE, _MAX_LANE_TILE)
    row_cap = max(sub, target // (tC * itemsize))
    tR1 = _pick_tile(R1, sub, row_cap)
    slab = _round_up(tR1, sub) * _round_up(tC, _LANE) * itemsize
    tR0 = int(min(R0, max(1, target // slab)))

    def pipeline_bytes(a, b, c):
        x_blk = a * _round_up(b, sub) * _round_up(c, _LANE) * itemsize
        p_blk = _round_up(b, sub) * (_LANE if pos_is_column else _round_up(c, _LANE)) * itemsize
        return 2 * (2 * x_blk + p_blk)    # double-buffered x, out and pos

    # Shrink-to-fit: never let the pipeline footprint exceed the scoped VMEM budget.
    while pipeline_bytes(tR0, tR1, tC) > budget:
        if tR0 > 1:
            tR0 = max(1, tR0 // 2)
        elif tR1 > sub:
            tR1 = max(sub, _round_up(tR1 // 2, sub))
        elif tC > _LANE:
            tC = max(_LANE, _round_up(tC // 2, _LANE))
        else:
            break

    # ---- megacore split: only on 2-TensorCore chips (v7x) -------------------------
    total_bytes = R0 * R1 * C * itemsize
    if (two_tc
            and pl.cdiv(R0, tR0) * pl.cdiv(R1, tR1) * pl.cdiv(C, tC) == 1
            and total_bytes >= (2 << 20)):
        if R1 >= 2 * sub:                 # split the leading parallel grid axis first
            tR1 = max(sub, _round_up(pl.cdiv(R1, 2), sub))
        elif C >= 2 * _LANE:
            tC = max(_LANE, _round_up(pl.cdiv(C, 2), _LANE))
        elif R0 >= 2:
            tR0 = pl.cdiv(R0, 2)

    nR1, nC, nR0 = pl.cdiv(R1, tR1), pl.cdiv(C, tC), pl.cdiv(R0, tR0)

    # ---- grid / specs: r1 slowest so the pos block stays VMEM-resident ------------
    grid = (nR1, nC, nR0)
    x_spec = pl.BlockSpec((tR0, tR1, tC), lambda r1, c, r0: (r0, r1, c))
    o_spec = pl.BlockSpec((tR0, tR1, tC), lambda r1, c, r0: (r0, r1, c))
    if pos_is_column:
        p_spec = pl.BlockSpec((tR1, 1), lambda r1, c, r0: (r1, 0))
    else:
        p_spec = pl.BlockSpec((tR1, tC), lambda r1, c, r0: (r1, c))

    cost = pl.CostEstimate(
        flops=int(x3.size),
        transcendentals=0,
        bytes_accessed=int(2 * x3.size * itemsize + pos3.size * itemsize),
    )

    out3 = pl.pallas_call(
        _pos_add_kernel,
        out_shape=jax.ShapeDtypeStruct((R0, R1, C), dtype),
        grid_spec=pltpu.PrefetchScalarGridSpec(
            num_scalar_prefetch=0,
            grid=grid,
            in_specs=[x_spec, p_spec],
            out_specs=o_spec,
        ),
        compiler_params=pltpu.CompilerParams(
            dimension_semantics=("parallel", "parallel", "parallel"),
            vmem_limit_bytes=int(vmem_limit),
        ),
        cost_estimate=cost,
    )(x3, pos3)

    if E % _LANE == 0:
        return out3
    return out3[..., :c_orig].reshape(B, S, E)


if __name__ == "__main__":
    key = jax.random.PRNGKey(0)
    k1, k2, k3, k4, k5, k6 = jax.random.split(key, 6)

    # 1) Small unaligned E -> grouped flat path (lane-aligned, no padding).
    B, S, E = 2, 8, 32
    x = jax.random.normal(k1, (B, S, E), dtype=jnp.float32)
    pos = jax.random.normal(k2, (S, 1), dtype=jnp.float32)
    out = jax.block_until_ready(positional_embedding(x, pos))
    ref = x + pos[None, :, :]
    assert out.shape == (B, S, E)
    assert jnp.allclose(out, ref, atol=1e-6), "mismatch (flat grouped path)"

    # 2) 128-aligned E -> row path (pos kept as (S, 1) column, no materialisation).
    B2, S2, E2 = 2, 16, 128
    x2 = jax.random.normal(k3, (B2, S2, E2), dtype=jnp.float32)
    pos2 = jax.random.normal(k4, (S2, 1), dtype=jnp.float32)
    out2 = jax.block_until_ready(positional_embedding(x2, pos2))
    assert jnp.allclose(out2, x2 + pos2[None, :, :], atol=1e-6), "mismatch (row path)"

    # 3) Truly unaligned (S*E % 128 != 0) -> padded flat path (unmasked stores).
    B3, S3, E3 = 2, 8, 24
    x3 = jax.random.normal(k5, (B3, S3, E3), dtype=jnp.float32)
    pos3 = jax.random.normal(k6, (S3, 1), dtype=jnp.float32)
    out3 = jax.block_until_ready(positional_embedding(x3, pos3))
    assert jnp.allclose(out3, x3 + pos3[None, :, :], atol=1e-6), "mismatch (padded path)"

    print("KERNEL_OK")
</pallas_src>

<mosaic_0001>
module attributes {stable_mosaic.version = 11 : i64} {
  func.func @_pos_add_kernel(%arg0: i32, %arg1: i32, %arg2: i32, %arg3: memref<2x2x128xf32, #tpu.memory_space<vmem>>, %arg4: memref<2x128xf32, #tpu.memory_space<vmem>>, %arg5: memref<2x2x128xf32, #tpu.memory_space<vmem>>) attributes {dimension_semantics = [#tpu.dimension_semantics<parallel>, #tpu.dimension_semantics<parallel>, #tpu.dimension_semantics<parallel>], iteration_bounds = array<i64: 1, 1, 1>, scalar_prefetch = 0 : i64, scratch_operands = 0 : i64, tpu.core_type = #tpu.core_type<tc>, window_params = [{transform_indices = @transform_0, window_bounds = array<i64: 2, 2, 128>}, {transform_indices = @transform_1, window_bounds = array<i64: 2, 128>}, {transform_indices = @transform_2, window_bounds = array<i64: 2, 2, 128>}]} {
    %c0 = arith.constant 0 : index
    %c0_0 = arith.constant 0 : index
    %c0_1 = arith.constant 0 : index
    %0 = vector.load %arg3[%c0, %c0_0, %c0_1] : memref<2x2x128xf32, #tpu.memory_space<vmem>>, vector<2x2x128xf32>
    %c0_2 = arith.constant 0 : index
    %c0_3 = arith.constant 0 : index
    %1 = vector.load %arg4[%c0_2, %c0_3] : memref<2x128xf32, #tpu.memory_space<vmem>>, vector<2x128xf32>
    %2 = vector.shape_cast %1 : vector<2x128xf32> to vector<1x2x128xf32>
    %3 = vector.broadcast %2 : vector<1x2x128xf32> to vector<2x2x128xf32>
    %4 = arith.addf %0, %3 : vector<2x2x128xf32>
    %c0_4 = arith.constant 0 : index
    %c0_5 = arith.constant 0 : index
    %c0_6 = arith.constant 0 : index
    %5 = vector.load %arg5[%c0_4, %c0_5, %c0_6] : memref<2x2x128xf32, #tpu.memory_space<vmem>>, vector<2x2x128xf32>
    tpu.vector_store %arg5[%c0_4, %c0_5, %c0_6], %4 {strides = array<i32>} : memref<2x2x128xf32, #tpu.memory_space<vmem>>, vector<2x2x128xf32>,
    return
  }
  func.func @transform_0(%arg0: i32, %arg1: i32, %arg2: i32) -> (i32, i32, i32) {
    %c0_i32 = arith.constant 0 : i32
    return %arg2, %arg0, %arg1 : i32, i32, i32
  }
  func.func @transform_1(%arg0: i32, %arg1: i32, %arg2: i32) -> (i32, i32) {
    %c0_i32 = arith.constant 0 : i32
    return %arg0, %arg1 : i32, i32
  }
  func.func @transform_2(%arg0: i32, %arg1: i32, %arg2: i32) -> (i32, i32, i32) {
    %c0_i32 = arith.constant 0 : i32
    return %arg2, %arg0, %arg1 : i32, i32, i32
  }
}

</mosaic_0001>

<bundles_post_ra>
// kernel: tpu_custom_call.1
= control target key start
LH: loop header
LB: loop body
LE: loop exit
PB: predicated region body
PF: predicated region fallthrough
CT: control target
= control target key end

     0   :  { %7 = vsyncpa [#allocation3], 0  ;;  %s169_s0 = inlined_call_operand.hbm [shape: f32[2,2,128], index: 0, kind: input, shape index: {}]   ;;  %s170_s1 = inlined_call_operand.hbm [shape: f32[2,128], index: 1, kind: input, shape index: {}]   ;;  %s171_s2 = inlined_call_operand.hbm [shape: f32[2,2,128], index: 2, kind: output, shape index: {}]  }
   0x1   :  { %8 = vsyncpa [#allocation6], 0 }
   0x2   :  { %9 = vsyncpa [#allocation4], 0  ;;  %s134_s9 = smov [#allocation2]  }
   0x3   :  { %s15_s10 = sshll.u32 %s134_s9, 4  ;;  %s16_s10 = int_to_ptr.vmem [resolvable:$true] %s15_s10 }
   0x4   :  { %s76_s11 = scalar_lea.vmem %s16_s10, 64  ;;  %p81_p1 = scmp.lt.s32.totalorder %s16_s10, %s16_s10 }
   0x5   :  { %p77_p0 = scmp.ne.s32.totalorder %s16_s10, %s76_s11  ;;  %p82_p2 = scmp.lt.s32.totalorder %s76_s11, %s76_s11 }
   0x7   :  { %p83_p3 = por %p82_p2, %p81_p1 }
   0x9   :  { %p84_p4 = pnand %p83_p3, %p77_p0 }
   0xb   :  { %87 = shalt.err (!%p84_p4)
}
   0xc   :  { %s135_s12 = smov 32   ;;  %s136_s13 = smov 2  }
   0xd   :  { %21 = dma.hbm_to_vmem [thread:$0]  %s169_s0, 64, %s16_s10, [#allocation3], %s135_s12, %s135_s12, %s136_s13  }
   0xe   :  { %s137_s16 = smov [#allocation5]  }
   0xf   :  { %s28_s17 = sshll.u32 %s137_s16, 4  ;;  %s29_s17 = int_to_ptr.vmem [resolvable:$true] %s28_s17 }
  0x10   :  { %s96_s18 = scalar_lea.vmem %s29_s17, 32  ;;  %p101_p6 = scmp.lt.s32.totalorder %s29_s17, %s29_s17 }
  0x11   :  { %p97_p5 = scmp.ne.s32.totalorder %s29_s17, %s96_s18  ;;  %p102_p7 = scmp.lt.s32.totalorder %s96_s18, %s96_s18 }
  0x13   :  { %p103_p8 = por %p102_p7, %p101_p6 }
  0x15   :  { %p104_p9 = pnand %p103_p8, %p97_p5 }
  0x17   :  { %107 = shalt.err (!%p104_p9)
}
  0x18   :  { %31 = dma.hbm_to_vmem [thread:$0]  %s170_s1, 32, %s29_s17, [#allocation6]  }
  0x19   :  { %128 = dma.done.wait [#allocation3], 64  }
  0x1a   :  { %129 = vsyncadd [#allocation3], 4294967232 }
  0x1b   :  { %130 = dma.done.wait [#allocation6], 32  }
  0x1c   :  { %131 = vsyncadd [#allocation6], 4294967264  ;;  %s138_s21 = smov [#allocation7]   ;;  %v38_v0 = vld [vmem:[#allocation2] sm:$0x3] }
  0x1d   :  { %s50_s0 = sshll.u32 %s138_s21, 4  ;;  %v40_v1 = vld [vmem:[#allocation5] sm:$0x3]  ;;  %v39_v2 = vld [vmem:[#allocation2 + $0x2] sm:$0x3]  ;;  %s51_s0 = int_to_ptr.vmem [resolvable:$true] %s50_s0 }
  0x1e   :  { %v41_v3 = vadd.f32 %v40_v1, %v38_v0  ;;  %v42_v4 = vadd.f32 %v40_v1, %v39_v2  ;;  %s108_s22 = scalar_lea.vmem %s51_s0, 64  ;;  %p113_p11 = scmp.lt.s32.totalorder %s51_s0, %s51_s0 }
  0x1f   :  { %p109_p10 = scmp.ne.s32.totalorder %s51_s0, %s108_s22  ;;  %p114_p12 = scmp.lt.s32.totalorder %s108_s22, %s108_s22 }
  0x20   :  { %43 = vst [vmem:[#allocation7] sm:$0x3] %v41_v3  ;;  %44 = vst [vmem:[#allocation7 + $0x2] sm:$0x3] %v42_v4 }
  0x21   :  { %p115_p13 = por %p114_p12, %p113_p11 }
  0x23   :  { %p116_p0 = pnand %p115_p13, %p109_p10 }
  0x25   :  { %119 = shalt.err (!%p116_p0)
}
  0x26   :  { %56 = dma.vmem_to_hbm [thread:$0]  %s51_s0, 64, %s171_s2, [#allocation4], %s135_s12, %s135_s12, %s136_s13  }
  0x27   :  { %132 = dma.done.wait [#allocation4], 64  }
  0x28   :  { %133 = vsyncadd [#allocation4], 4294967232 }
  0x29   :  { %60 = vsyncpa [#allocation3], 1 }
  0x2a   :  { %61 = vsyncpa [#allocation6], 1 }
  0x2b   :  { %62 = vsyncpa [#allocation4], 1 }

</bundles_post_ra>
